<compile_context>
chip_gen: v7x
topology: tpu7x:2x2x1
jax: 0.10.0
libtpu: 0.0.40
codegen_flags: <defaults>
</compile_context>

<pallas_src>
import functools

import jax
import jax.numpy as jnp
import numpy as np
from jax.experimental import pallas as pl
from jax.experimental.pallas import tpu as pltpu

RATES = [1, 6, 12, 18]
BN_EPS = 1e-5
LANE = 128


# ----------------------------------------------------------------------------
# One-time feature probe (tiny pallas_call, run once per process):
#   * pltpu.roll direction (documented jnp.roll semantics; verified so a
#     semantics flip can never silently reverse the conv tap shifts)
#   * whether pl.BlockSpec(pipeline_mode=pl.Buffered(1)) is accepted, so the
#     constant weight/bias/mask blocks can be single-buffered.
# ----------------------------------------------------------------------------
_PROBE = None


def _probe_features():
    global _PROBE
    if _PROBE is not None:
        return _PROBE

    def probe(x_ref, o_ref):
        o_ref[...] = pltpu.roll(x_ref[...], shift=1, axis=1)

    x = jax.lax.broadcasted_iota(jnp.float32, (8, LANE), 1)
    out_shape = jax.ShapeDtypeStruct((8, LANE), jnp.float32)
    try:
        y = pl.pallas_call(
            probe, out_shape=out_shape, grid=(1,),
            in_specs=[pl.BlockSpec((8, LANE), lambda i: (0, 0),
                                   pipeline_mode=pl.Buffered(1))],
            out_specs=pl.BlockSpec((8, LANE), lambda i: (0, 0)))(x)
        single_buf_ok = True
    except Exception:
        y = pl.pallas_call(probe, out_shape=out_shape)(x)
        single_buf_ok = False
    roll_like_jnp = bool(np.asarray(jax.block_until_ready(y))[0, 1] == 0.0)
    _PROBE = (roll_like_jnp, single_buf_ok)
    return _PROBE


def _vmem_limit_bytes():
    # ~84% of physical VMEM: ~107 MiB on 128 MiB parts (v5e/v6e), ~54 MiB on
    # v7x (64 MiB/TC), leaving headroom for compiler-internal scratch.
    cap = None
    try:
        info = pltpu.get_tpu_info()
        for name in ("vmem_capacity_bytes", "vmem_size_bytes"):
            v = getattr(info, name, None)
            if v:
                cap = int(v)
                break
    except Exception:
        cap = None
    if cap is None:
        return 64 * 1024 * 1024          # conservative, known-good default
    return int(cap * 0.84)


def _pick_cin_tile(C_in):
    # Reduction tile over input channels.  Must be a multiple of 8 (sublane)
    # or the full channel dim to satisfy the (8, 128) block constraint.
    if C_in <= 256:
        return C_in
    for t in (256, 128, 64, 32, 16, 8):
        if C_in % t == 0:
            return t
    return C_in


# ----------------------------------------------------------------------------
# Pallas kernel
# ----------------------------------------------------------------------------
def make_aspp_kernel(H, W, HWp, C_out, rates, roll_like_jnp, stack_taps):
    n_branch = len(rates)                 # 4 conv branches (1x1 + 3 dilated)
    hw_inv = 1.0 / (H * W)

    def shift_cols(t, off):
        # returns ts with ts[:, p] = t[:, (p + off) mod HWp]  (XLU rotate;
        # jnp.roll semantics are out[i] = x[i - shift] -> shift = -off)
        amt = (-off) % HWp if roll_like_jnp else off % HWp
        return pltpu.roll(t, shift=amt, axis=1)

    def kernel(x_ref, w1_ref, w3_ref, wg_ref, wp_ref, bn_ref, mask_ref, o_ref,
               *scratch):
        # x_ref:  [1, cin_tile, HWp]      bf16 (zero-padded flat spatial)
        # w1_ref: [C_out, cin_tile]       bf16 (BN scale folded)
        # w3_ref: [3, 9*C_out, cin_tile]  bf16 (BN scale folded, rows tap-major)
        # wg_ref: [C_out, cin_tile]       bf16 (GAP conv; ReLU precedes its BN)
        # wp_ref: [5, C_out, C_out]       bf16 (projection, BN scale folded)
        # bn_ref: [7, C_out, 1]           f32  (0-3 branch biases, 4/5 GAP BN
        #                                       scale/bias, 6 projection bias)
        # mask_ref: [3, 9, 1, HWp]        f32  per-tap boundary masks
        accs = scratch[:n_branch]      # 4x (C_out, HWp) f32 pre-activation sums
        gacc = scratch[n_branch]       # (C_out, 1) f32 GAP pre-activation sum
        k = pl.program_id(1)

        @pl.when(k == 0)
        def _():
            for r in accs:
                r[...] = jnp.zeros_like(r)
            gacc[...] = jnp.zeros_like(gacc)

        x = x_ref[0]                                     # (cin_tile, HWp) bf16

        # ---- GAP branch: partial channel means over this C_in tile ---------
        gap = (jnp.sum(x, axis=1, keepdims=True, dtype=jnp.float32)
               * hw_inv).astype(jnp.bfloat16)            # (cin_tile, 1)
        gacc[...] += jnp.dot(wg_ref[...], gap,
                             preferred_element_type=jnp.float32)

        # ---- branch 0: 1x1 conv partial sum ---------------------------------
        accs[0][...] += jnp.dot(w1_ref[...], x,
                                preferred_element_type=jnp.float32)

        # ---- branches 1..3: dilated 3x3 conv partial sums --------------------
        for b, rate in enumerate(rates[1:]):
            if stack_taps:
                # One (9*C_out, cin_tile) @ (cin_tile, HWp) matmul per branch
                # (MXU row utilization at small C_out); slice taps afterwards.
                t_all = jnp.dot(w3_ref[b], x,
                                preferred_element_type=jnp.float32)
                get_tap = lambda tap, _t=t_all: _t[tap * C_out:(tap + 1) * C_out]
            else:
                # Large C_out: per-tap matmuls avoid a (9*C_out, HWp) f32 blob.
                get_tap = lambda tap, _b=b: jnp.dot(
                    w3_ref[_b, pl.ds(tap * C_out, C_out), :], x,
                    preferred_element_type=jnp.float32)

            branch_sum = None
            for ky in range(3):
                for kx in range(3):
                    dy, dx = (ky - 1) * rate, (kx - 1) * rate
                    if abs(dy) >= H or abs(dx) >= W:
                        continue          # tap never lands inside the image
                    tap = ky * 3 + kx
                    t = get_tap(tap)
                    if dy == 0 and dx == 0:
                        contrib = t
                    else:
                        # boundary mask is per output column (precomputed in
                        # the wrapper) and applied post-matmul
                        contrib = shift_cols(t, dy * W + dx) * mask_ref[b, tap]
                    branch_sum = contrib if branch_sum is None \
                        else branch_sum + contrib
            accs[b + 1][...] += branch_sum   # one scratch update per branch

        # ---- epilogue on the last C_in tile: bias + ReLU + projection -------
        @pl.when(k == pl.num_programs(1) - 1)
        def _():
            g = jnp.maximum(gacc[...], 0.0)              # Conv -> ReLU
            g = g * bn_ref[4] + bn_ref[5]                # -> BN (module order)
            # GAP branch folds into a (C_out, 1) projection bias.
            yp = jnp.dot(wp_ref[4], g.astype(jnp.bfloat16),
                         preferred_element_type=jnp.float32)
            for i in range(n_branch):
                fi = jnp.maximum(accs[i][...] + bn_ref[i], 0.0)
                yp = yp + jnp.dot(wp_ref[i], fi.astype(jnp.bfloat16),
                                  preferred_element_type=jnp.float32)
            out = jnp.maximum(yp + bn_ref[6], 0.0)
            # Dropout(0.2) is identity in inference mode.
            # Padded columns [HW, HWp) hold garbage; the wrapper slices them off.
            o_ref[0] = out.astype(o_ref.dtype)

    return kernel


# ----------------------------------------------------------------------------
# Wrapper
# ----------------------------------------------------------------------------
@functools.partial(jax.jit,
                   static_argnames=("roll_like_jnp", "single_buf", "vmem_limit"))
def _aspp_forward(x, w1, w3_k, wg, wp, bn_scale, bn_bias, *,
                  roll_like_jnp, single_buf, vmem_limit):
    N, C_in, H, W = x.shape
    C_out = w1.shape[0]
    HW = H * W
    HWp = ((HW + LANE - 1) // LANE) * LANE        # lane-dense spatial axis

    # Fold eval-mode BN scales into the conv weights (branches 0-3 + project);
    # cast all weights + activations to bf16 for the MXU.
    w1f = (bn_scale[0][:, None] * w1).astype(jnp.bfloat16)
    w3f = (bn_scale[1:4][:, None, :, None] * w3_k)             # (3,9,C_out,C_in)
    w3f = w3f.reshape(3, 9 * C_out, C_in).astype(jnp.bfloat16)  # rows tap-major
    wgf = wg.astype(jnp.bfloat16)                 # GAP conv: ReLU precedes its BN
    wpf = (bn_scale[5][:, None] * wp).reshape(C_out, 5, C_out)
    wpf = wpf.transpose(1, 0, 2).astype(jnp.bfloat16)           # (5,C_out,C_out)

    bn_pack = jnp.concatenate(
        [bn_bias[0:4],                    # branch biases (scales already folded)
         bn_scale[4:5], bn_bias[4:5],     # GAP BN (ReLU precedes it -> unfolded)
         bn_bias[5:6]], axis=0)[:, :, None]                     # (7, C_out, 1)

    # Precomputed per-tap boundary masks (one column per flattened position).
    pos = np.arange(HWp)
    r_, c_ = pos // W, pos % W
    masks_np = np.zeros((3, 9, 1, HWp), np.float32)
    for b, rate in enumerate(RATES[1:]):
        for ky in range(3):
            for kx in range(3):
                dy, dx = (ky - 1) * rate, (kx - 1) * rate
                valid = ((r_ + dy >= 0) & (r_ + dy < H) &
                         (c_ + dx >= 0) & (c_ + dx < W) & (pos < HW))
                masks_np[b, ky * 3 + kx, 0] = valid
    masks = jnp.asarray(masks_np)

    x_flat = x.reshape(N, C_in, HW).astype(jnp.bfloat16)
    if HWp != HW:
        x_flat = jnp.pad(x_flat, ((0, 0), (0, 0), (0, HWp - HW)))

    cin_tile = _pick_cin_tile(C_in)
    K = C_in // cin_tile
    stack_taps = C_out < 128          # stacked-tap matmul only while it's small

    kernel = make_aspp_kernel(H, W, HWp, C_out, RATES, roll_like_jnp, stack_taps)

    # Single-buffer blocks whose index_map is constant across the whole grid.
    const_kw = dict(pipeline_mode=pl.Buffered(1)) if single_buf else {}

    grid_spec = pltpu.PrefetchScalarGridSpec(
        num_scalar_prefetch=0,
        grid=(N, K),                                   # reduction axis last
        in_specs=[
            pl.BlockSpec((1, cin_tile, HWp), lambda n, k: (n, k, 0)),
            pl.BlockSpec((C_out, cin_tile), lambda n, k: (0, k)),
            pl.BlockSpec((3, 9 * C_out, cin_tile), lambda n, k: (0, 0, k)),
            pl.BlockSpec((C_out, cin_tile), lambda n, k: (0, k)),
            pl.BlockSpec((5, C_out, C_out), lambda n, k: (0, 0, 0), **const_kw),
            pl.BlockSpec((7, C_out, 1), lambda n, k: (0, 0, 0), **const_kw),
            pl.BlockSpec((3, 9, 1, HWp), lambda n, k: (0, 0, 0, 0), **const_kw),
        ],
        out_specs=pl.BlockSpec((1, C_out, HWp), lambda n, k: (n, 0, 0)),
        scratch_shapes=[pltpu.VMEM((C_out, HWp), jnp.float32)] * 4
                     + [pltpu.VMEM((C_out, 1), jnp.float32)],
    )

    out = pl.pallas_call(
        kernel,
        out_shape=jax.ShapeDtypeStruct((N, C_out, HWp), jnp.bfloat16),
        grid_spec=grid_spec,
        compiler_params=pltpu.CompilerParams(
            dimension_semantics=("parallel", "arbitrary"),
            vmem_limit_bytes=vmem_limit),
    )(x_flat, w1f, w3f, wgf, wpf, bn_pack, masks)
    return out[:, :, :HW].reshape(N, C_out, H, W).astype(x.dtype)


def aspp_forward(x, w1, w3_k, wg, wp, bn_scale, bn_bias):
    roll_like_jnp, single_buf = _probe_features()
    return _aspp_forward(x, w1, w3_k, wg, wp, bn_scale, bn_bias,
                         roll_like_jnp=roll_like_jnp, single_buf=single_buf,
                         vmem_limit=_vmem_limit_bytes())


# ----------------------------------------------------------------------------
# Pure-JAX reference (for verification only)
# ----------------------------------------------------------------------------
def reference_forward(x, w1, w3_oihw, wg, wp, bn_scale, bn_bias):
    N, C_in, H, W = x.shape
    C_out = w1.shape[0]

    def conv2d(inp, w, pad, dil):
        return jax.lax.conv_general_dilated(
            inp, w, (1, 1), [(pad, pad), (pad, pad)],
            rhs_dilation=(dil, dil),
            dimension_numbers=("NCHW", "OIHW", "NCHW"))

    def bn(y, k):
        return y * bn_scale[k][None, :, None, None] + bn_bias[k][None, :, None, None]

    feats = [jnp.maximum(bn(conv2d(x, w1[:, :, None, None], 0, 1), 0), 0.0)]
    for b, r in enumerate(RATES[1:]):
        feats.append(jnp.maximum(bn(conv2d(x, w3_oihw[b], r, r), b + 1), 0.0))
    gap = x.mean(axis=(2, 3), keepdims=True)
    g = jnp.maximum(conv2d(gap, wg[:, :, None, None], 0, 1), 0.0)
    g = jnp.broadcast_to(g, (N, C_out, H, W))      # bilinear from 1x1 == const
    feats.append(bn(g, 4))
    cat = jnp.concatenate(feats, axis=1)
    y = jnp.maximum(bn(conv2d(cat, wp[:, :, None, None], 0, 1), 5), 0.0)
    return y


# ----------------------------------------------------------------------------
# Deterministic parameter init
# ----------------------------------------------------------------------------
def init_params(key, C_in, C_out):
    ks = jax.random.split(key, 12)
    w1 = 0.2 * jax.random.normal(ks[0], (C_out, C_in), jnp.float32)
    w3_oihw = [0.2 * jax.random.normal(ks[1 + i], (C_out, C_in, 3, 3), jnp.float32)
               for i in range(3)]
    wg = 0.2 * jax.random.normal(ks[4], (C_out, C_in), jnp.float32)
    wp = 0.1 * jax.random.normal(ks[5], (C_out, 5 * C_out), jnp.float32)

    gamma = 1.0 + 0.1 * jax.random.normal(ks[6], (6, C_out), jnp.float32)
    beta = 0.1 * jax.random.normal(ks[7], (6, C_out), jnp.float32)
    rmean = 0.1 * jax.random.normal(ks[8], (6, C_out), jnp.float32)
    rvar = 0.5 + jax.random.uniform(ks[9], (6, C_out), jnp.float32)
    bn_scale = gamma / jnp.sqrt(rvar + BN_EPS)
    bn_bias = beta - rmean * bn_scale

    # kernel-friendly layout for the 3 dilated convs: [branch, tap, C_out, C_in]
    w3_k = jnp.stack([w.transpose(2, 3, 0, 1).reshape(9, C_out, C_in)
                      for w in w3_oihw])
    return dict(w1=w1, w3_oihw=w3_oihw, w3_k=w3_k, wg=wg, wp=wp,
                bn_scale=bn_scale, bn_bias=bn_bias)


if __name__ == "__main__":
    N, C_in, C_out, H, W = 2, 4, 8, 16, 16
    root = jax.random.PRNGKey(0)
    kx, kp = jax.random.split(root)
    x = jax.random.normal(kx, (N, C_in, H, W), jnp.float32)
    P = init_params(kp, C_in, C_out)

    out = aspp_forward(x, P["w1"], P["w3_k"], P["wg"], P["wp"],
                       P["bn_scale"], P["bn_bias"])
    out = jax.block_until_ready(out)

    ref = reference_forward(x, P["w1"], P["w3_oihw"], P["wg"], P["wp"],
                            P["bn_scale"], P["bn_bias"])
    # Tolerance accounts for bf16 MXU matmuls (f32 accumulation) and the bf16
    # kernel output vs an f32 reference.
    np.testing.assert_allclose(np.asarray(out), np.asarray(ref),
                               atol=5e-2, rtol=5e-2)
    print("KERNEL_OK")
</pallas_src>

<mosaic_0001>
module attributes {stable_mosaic.version = 11 : i64} {
  func.func @probe(%arg0: i32, %arg1: memref<8x128xf32, #tpu.memory_space<vmem>>, %arg2: memref<8x128xf32, #tpu.memory_space<vmem>>) attributes {dimension_semantics = [#tpu.dimension_semantics<arbitrary>], iteration_bounds = array<i64: 1>, scalar_prefetch = 0 : i64, scratch_operands = 0 : i64, tpu.core_type = #tpu.core_type<tc>, window_params = [{pipeline_mode = #tpu.pipeline_mode<synchronous>, transform_indices = @transform_0, window_bounds = array<i64: 8, 128>}, {pipeline_mode = #tpu.pipeline_mode<synchronous>, transform_indices = @transform_1, window_bounds = array<i64: 8, 128>}]} {
    %c0 = arith.constant 0 : index
    %c0_0 = arith.constant 0 : index
    %0 = vector.load %arg1[%c0, %c0_0] : memref<8x128xf32, #tpu.memory_space<vmem>>, vector<8x128xf32>
    %c1_i32 = arith.constant 1 : i32
    %1 = tpu.dynamic_rotate %0 by %c1_i32 dim 1 : vector<8x128xf32>, i32 -> vector<8x128xf32>
    %c0_1 = arith.constant 0 : index
    %c0_2 = arith.constant 0 : index
    %2 = vector.load %arg2[%c0_1, %c0_2] : memref<8x128xf32, #tpu.memory_space<vmem>>, vector<8x128xf32>
    tpu.vector_store %arg2[%c0_1, %c0_2], %1 {strides = array<i32>} : memref<8x128xf32, #tpu.memory_space<vmem>>, vector<8x128xf32>,
    return
  }
  func.func @transform_0(%arg0: i32) -> (i32, i32) {
    %c0_i32 = arith.constant 0 : i32
    %c0_i32_0 = arith.constant 0 : i32
    %c0_i32_1 = arith.constant 0 : i32
    return %c0_i32, %c0_i32_0 : i32, i32
  }
  func.func @transform_1(%arg0: i32) -> (i32, i32) {
    %c0_i32 = arith.constant 0 : i32
    %c0_i32_0 = arith.constant 0 : i32
    %c0_i32_1 = arith.constant 0 : i32
    return %c0_i32, %c0_i32_0 : i32, i32
  }
}

module attributes {stable_mosaic.version = 11 : i64} {
  func.func @probe(%arg0: memref<8x128xf32, #tpu.memory_space<vmem>>, %arg1: memref<8x128xf32, #tpu.memory_space<vmem>>) attributes {dimension_semantics = [], scalar_prefetch = 0 : i64, scratch_operands = 0 : i64, tpu.core_type = #tpu.core_type<tc>} {
    %c0 = arith.constant 0 : index
    %c0_0 = arith.constant 0 : index
    %0 = vector.load %arg0[%c0, %c0_0] : memref<8x128xf32, #tpu.memory_space<vmem>>, vector<8x128xf32>
    %c1_i32 = arith.constant 1 : i32
    %1 = tpu.dynamic_rotate %0 by %c1_i32 dim 1 : vector<8x128xf32>, i32 -> vector<8x128xf32>
    %c0_1 = arith.constant 0 : index
    %c0_2 = arith.constant 0 : index
    %2 = vector.load %arg1[%c0_1, %c0_2] : memref<8x128xf32, #tpu.memory_space<vmem>>, vector<8x128xf32>
    tpu.vector_store %arg1[%c0_1, %c0_2], %1 {strides = array<i32>} : memref<8x128xf32, #tpu.memory_space<vmem>>, vector<8x128xf32>,
    return
  }
}

</mosaic_0001>

<bundles_post_ra>
// kernel: tpu_custom_call.1
= control target key start
LH: loop header
LB: loop body
LE: loop exit
PB: predicated region body
PF: predicated region fallthrough
CT: control target
= control target key end

     0   :  { %6 = vsyncpa [#allocation3], 0  ;;  %s128_s0 = inlined_call_operand.hbm [shape: f32[8,128], index: 0, kind: input, shape index: {}]   ;;  %s129_s1 = inlined_call_operand.hbm [shape: f32[8,128], index: 1, kind: output, shape index: {}]  }
   0x1   :  { %7 = vsyncpa [#allocation4], 0  ;;  %s91_s6 = smov [#allocation2]   ;;  %s43_s10 = scalar_lea.hbm %s128_s0, 128 }
   0x2   :  { %s14_s7 = sshll.u32 %s91_s6, 4  ;;  %p44_p0 = scmp.ne.s32.totalorder %s128_s0, %s43_s10  ;;  %s15_s7 = int_to_ptr.vmem [resolvable:$true] %s14_s7 }
   0x3   :  { %p47_p1 = scmp.lt.u32.totalorder %s43_s10, %s128_s0 }
   0x5   :  { %p49_p2 = pnand %p47_p1, %p44_p0 }
   0x7   :  { %52 = shalt.err (!%p49_p2)
}
   0x8   :  { %s53_s15 = scalar_lea.vmem %s15_s7, 128  ;;  %p58_p4 = scmp.lt.s32.totalorder %s15_s7, %s15_s7 }
   0x9   :  { %p54_p3 = scmp.ne.s32.totalorder %s15_s7, %s53_s15  ;;  %p59_p5 = scmp.lt.s32.totalorder %s53_s15, %s53_s15 }
   0xb   :  { %p60_p6 = por %p59_p5, %p58_p4 }
   0xd   :  { %p61_p7 = pnand %p60_p6, %p54_p3 }
   0xf   :  { %64 = shalt.err (!%p61_p7)
}
  0x10   :  { %17 = dma.hbm_to_vmem [thread:$0]  %s128_s0, 128, %s15_s7, [#allocation3]  }
  0x11   :  { %87 = dma.done.wait [#allocation3], 128  }
  0x12   :  { %88 = vsyncadd [#allocation3], 4294967168  ;;  %v21_v0 = vld [vmem:[#allocation2] sm:$0xff]  ;;  %s92_s18 = smov 1   ;;  %s93_s19 = smov [#allocation5]  }
  0x13   :  { %22 = vrot.lane.b32.xlu0 %v21_v0, %s92_s18  ;;  %s31_s20 = sshll.u32 %s93_s19, 4  ;;  %s32_s20 = int_to_ptr.vmem [resolvable:$true] %s31_s20 }
  0x14   :  { %s65_s21 = scalar_lea.vmem %s32_s20, 128  ;;  %p70_p9 = scmp.lt.s32.totalorder %s32_s20, %s32_s20 }
  0x15   :  { %p66_p8 = scmp.ne.s32.totalorder %s32_s20, %s65_s21  ;;  %p71_p10 = scmp.lt.s32.totalorder %s65_s21, %s65_s21 }
  0x17   :  { %p72_p11 = por %p71_p10, %p70_p9 }
  0x19   :  { %p73_p12 = pnand %p72_p11, %p66_p8 }
  0x85   :  { %v23_v1 = vpop.permute.xlu0 %22 }
  0x86   :  { %24 = vst [vmem:[#allocation5] sm:$0xff] %v23_v1 }
  0x87   :  { %76 = shalt.err (!%p73_p12)
}
  0x88   :  { %s77_s0 = scalar_lea.hbm %s129_s1, 128 }
  0x89   :  { %p78_p13 = scmp.ne.s32.totalorder %s129_s1, %s77_s0  ;;  %p81_p0 = scmp.lt.u32.totalorder %s77_s0, %s129_s1 }
  0x8b   :  { %p83_p1 = pnand %p81_p0, %p78_p13 }
  0x8d   :  { %86 = shalt.err (!%p83_p1)
}
  0x8e   :  { %34 = dma.vmem_to_hbm [thread:$0]  %s32_s20, 128, %s129_s1, [#allocation4]  }
  0x8f   :  { %89 = dma.done.wait [#allocation4], 128  }
  0x90   :  { %90 = vsyncadd [#allocation4], 4294967168 }
  0x91   :  { %38 = vsyncpa [#allocation3], 1 }
  0x92   :  { %39 = vsyncpa [#allocation4], 1 }

// kernel: tpu_custom_call.1
= control target key start
LH: loop header
LB: loop body
LE: loop exit
PB: predicated region body
PF: predicated region fallthrough
CT: control target
= control target key end

     0   :  { %6 = vsyncpa [#allocation3], 0  ;;  %s128_s0 = inlined_call_operand.hbm [shape: f32[8,128], index: 0, kind: input, shape index: {}]   ;;  %s129_s1 = inlined_call_operand.hbm [shape: f32[8,128], index: 1, kind: output, shape index: {}]  }
   0x1   :  { %7 = vsyncpa [#allocation4], 0  ;;  %s91_s6 = smov [#allocation2]   ;;  %s43_s10 = scalar_lea.hbm %s128_s0, 128 }
   0x2   :  { %s14_s7 = sshll.u32 %s91_s6, 4  ;;  %p44_p0 = scmp.ne.s32.totalorder %s128_s0, %s43_s10  ;;  %s15_s7 = int_to_ptr.vmem [resolvable:$true] %s14_s7 }
   0x3   :  { %p47_p1 = scmp.lt.u32.totalorder %s43_s10, %s128_s0 }
   0x5   :  { %p49_p2 = pnand %p47_p1, %p44_p0 }
   0x7   :  { %52 = shalt.err (!%p49_p2)
}
   0x8   :  { %s53_s15 = scalar_lea.vmem %s15_s7, 128  ;;  %p58_p4 = scmp.lt.s32.totalorder %s15_s7, %s15_s7 }
   0x9   :  { %p54_p3 = scmp.ne.s32.totalorder %s15_s7, %s53_s15  ;;  %p59_p5 = scmp.lt.s32.totalorder %s53_s15, %s53_s15 }
   0xb   :  { %p60_p6 = por %p59_p5, %p58_p4 }
   0xd   :  { %p61_p7 = pnand %p60_p6, %p54_p3 }
   0xf   :  { %64 = shalt.err (!%p61_p7)
}
  0x10   :  { %17 = dma.hbm_to_vmem [thread:$0]  %s128_s0, 128, %s15_s7, [#allocation3]  }
  0x11   :  { %87 = dma.done.wait [#allocation3], 128  }
  0x12   :  { %88 = vsyncadd [#allocation3], 4294967168  ;;  %v21_v0 = vld [vmem:[#allocation2] sm:$0xff]  ;;  %s92_s18 = smov 1   ;;  %s93_s19 = smov [#allocation5]  }
  0x13   :  { %22 = vrot.lane.b32.xlu0 %v21_v0, %s92_s18  ;;  %s31_s20 = sshll.u32 %s93_s19, 4  ;;  %s32_s20 = int_to_ptr.vmem [resolvable:$true] %s31_s20 }
  0x14   :  { %s65_s21 = scalar_lea.vmem %s32_s20, 128  ;;  %p70_p9 = scmp.lt.s32.totalorder %s32_s20, %s32_s20 }
  0x15   :  { %p66_p8 = scmp.ne.s32.totalorder %s32_s20, %s65_s21  ;;  %p71_p10 = scmp.lt.s32.totalorder %s65_s21, %s65_s21 }
  0x17   :  { %p72_p11 = por %p71_p10, %p70_p9 }
  0x19   :  { %p73_p12 = pnand %p72_p11, %p66_p8 }
  0x85   :  { %v23_v1 = vpop.permute.xlu0 %22 }
  0x86   :  { %24 = vst [vmem:[#allocation5] sm:$0xff] %v23_v1 }
  0x87   :  { %76 = shalt.err (!%p73_p12)
}
  0x88   :  { %s77_s0 = scalar_lea.hbm %s129_s1, 128 }
  0x89   :  { %p78_p13 = scmp.ne.s32.totalorder %s129_s1, %s77_s0  ;;  %p81_p0 = scmp.lt.u32.totalorder %s77_s0, %s129_s1 }
  0x8b   :  { %p83_p1 = pnand %p81_p0, %p78_p13 }
  0x8d   :  { %86 = shalt.err (!%p83_p1)
}
  0x8e   :  { %34 = dma.vmem_to_hbm [thread:$0]  %s32_s20, 128, %s129_s1, [#allocation4]  }
  0x8f   :  { %89 = dma.done.wait [#allocation4], 128  }
  0x90   :  { %90 = vsyncadd [#allocation4], 4294967168 }
  0x91   :  { %38 = vsyncpa [#allocation3], 1 }
  0x92   :  { %39 = vsyncpa [#allocation4], 1 }

</bundles_post_ra>
